<compile_context>
chip_gen: v6e
topology: v6e:2x2x1
jax: 0.10.0
libtpu: 0.0.40
codegen_flags: <defaults>
</compile_context>

<pallas_src>
import functools

import jax
import jax.numpy as jnp
from jax import lax
from jax.experimental import pallas as pl
from jax.experimental.pallas import tpu as pltpu


# Contract the last (feature) dim of both operands: (tm, tk) x (tn, tk) -> (tm, tn)
_NT_DIMS = (((1,), (1,)), ((), ()))


def _vmem_budgets():
    """(vmem_limit_bytes, tile_fit_budget, resident_z_threshold) per generation."""
    try:
        cap = int(pltpu.get_tpu_info().vmem_capacity_bytes)
    except Exception:
        cap = 64 * 1024 * 1024  # conservative default (v7x per-TC VMEM)
    limit = min(int(cap * 0.75), cap - (8 << 20))      # ~96 MiB v5e/v6e, ~48 MiB v7x
    limit = max(limit, 16 << 20)
    tile_budget = int(limit * 0.85)                     # headroom for compiler scratch
    resident = cap // 4                                 # ~32 MiB v5e/v6e, ~16 MiB v7x
    return limit, tile_budget, resident


def _sigmoid(x):
    # Exact sigmoid in an EUP-friendly form (tanh runs on the otherwise-idle
    # EUP slot; no VALU-side divide / Newton steps).
    return 0.5 * jnp.tanh(0.5 * x) + 0.5


# ---------------------------------------------------------------------------
# Kernels
# ---------------------------------------------------------------------------
def _fused_kernel(zl_ref, zr_ref, o_ref, *, use_sigmoid):
    """Single-pass (tk = D): o = act(zl @ zr.T), no accumulator needed."""
    acc = lax.dot_general(zl_ref[...], zr_ref[...], _NT_DIMS,
                          preferred_element_type=jnp.float32)
    if use_sigmoid:
        acc = _sigmoid(acc)
    o_ref[...] = acc.astype(o_ref.dtype)


def _fused_resident_kernel(zfull_ref, o_ref, *, use_sigmoid, tm, tn):
    """Single-pass with one VMEM-resident copy of z used for BOTH operands."""
    i = pl.program_id(0)
    j = pl.program_id(1)
    zl = zfull_ref[pl.ds(pl.multiple_of(i * tm, tm), tm), :]
    zr = zfull_ref[pl.ds(pl.multiple_of(j * tn, tn), tn), :]
    acc = lax.dot_general(zl, zr, _NT_DIMS, preferred_element_type=jnp.float32)
    if use_sigmoid:
        acc = _sigmoid(acc)
    o_ref[...] = acc.astype(o_ref.dtype)


def _reduce_f32out_kernel(zl_ref, zr_ref, o_ref, *, use_sigmoid):
    """k-reduction path, f32 output: accumulate straight into the output tile."""
    @pl.when(pl.program_id(2) == 0)
    def _():
        o_ref[...] = jnp.zeros_like(o_ref)

    o_ref[...] += lax.dot_general(zl_ref[...], zr_ref[...], _NT_DIMS,
                                  preferred_element_type=jnp.float32)

    if use_sigmoid:
        @pl.when(pl.program_id(2) == pl.num_programs(2) - 1)
        def _():
            o_ref[...] = _sigmoid(o_ref[...])


def _reduce_acc_kernel(zl_ref, zr_ref, o_ref, acc_ref, *, use_sigmoid):
    """k-reduction path, narrow output dtype: f32 VMEM scratch accumulator."""
    @pl.when(pl.program_id(2) == 0)
    def _():
        acc_ref[...] = jnp.zeros_like(acc_ref)

    acc_ref[...] += lax.dot_general(zl_ref[...], zr_ref[...], _NT_DIMS,
                                    preferred_element_type=jnp.float32)

    @pl.when(pl.program_id(2) == pl.num_programs(2) - 1)
    def _():
        acc = acc_ref[...]
        if use_sigmoid:
            acc = _sigmoid(acc)
        o_ref[...] = acc.astype(o_ref.dtype)


# ---------------------------------------------------------------------------
# Tiling helpers
# ---------------------------------------------------------------------------
def _pick_tile(n, cap, aligns):
    """Largest tile for an axis of extent n: the full extent if it fits `cap`,
    otherwise the largest multiple of one of `aligns` (tried in order) that
    divides n and is <= cap.  Falls back to the full extent (always legal)."""
    if n <= cap:
        return n
    for align in aligns:
        t = (cap // align) * align
        while t >= align:
            if n % t == 0:
                return t
            t -= align
    return n


# ---------------------------------------------------------------------------
# Wrapper
# ---------------------------------------------------------------------------
def decoder_forward(z, *, use_sigmoid=True, tm=None, tn=None, tk=None,
                    compute_dtype=None, out_dtype=None):
    """Pallas equivalent of Decoder.forward(z) = sigmoid(z @ z.T) (or z @ z.T).

    compute_dtype: optionally cast matmul operands (e.g. jnp.bfloat16) for the
      MXU-native path; accumulation and the activation stay in f32.
    out_dtype: defaults to z.dtype (module semantics).  When use_sigmoid=True
      the values live in [0, 1], so bf16 output halves the dominant N^2 store
      traffic at negligible accuracy cost -- pass out_dtype=jnp.bfloat16.
    """
    N, D = z.shape
    if out_dtype is None:
        out_dtype = z.dtype
    if compute_dtype is not None and z.dtype != jnp.dtype(compute_dtype):
        z = z.astype(compute_dtype)
    in_isz = jnp.dtype(z.dtype).itemsize
    out_isz = jnp.dtype(out_dtype).itemsize

    vmem_limit, tile_budget, resident_bytes = _vmem_budgets()

    # Sub-32-bit operands pack rows along sublanes: align tm to the packed row
    # count (8 for f32, 16 for bf16, 32 for 8-bit types).
    row_align = max(8, 32 // in_isz)
    lane_aligns = (256, 128)      # prefer 256x256-MXU-friendly tiles, fall back to 128

    # ---- tile selection ------------------------------------------------------
    if tm is None:
        tm = _pick_tile(N, 1024, (row_align,))
    if tn is None:
        tn = _pick_tile(N, 512, lane_aligns)

    # Keep >=2 blocks on the leading "parallel" axis so both TensorCores of a
    # v7x megacore get work (costs at most one extra ~0.35us grid step).
    if tm == N and N % 2 == 0 and (N // 2) % row_align == 0:
        tm = N // 2

    assert N % tm == 0 and N % tn == 0, "tm/tn must divide N"
    assert tm == N or tm % row_align == 0, \
        f"tm must be a multiple of {row_align} (or equal N)"
    assert tn == N or tn % 128 == 0, "tn must be a multiple of 128 (or equal N)"

    def fused_fits(tm_, tn_, resident):
        if resident:
            z_bytes = 2 * N * D * in_isz                       # single copy of z
        else:
            z_bytes = 2 * tm_ * D * in_isz + 2 * tn_ * D * in_isz
        return z_bytes + 2 * tm_ * tn_ * out_isz <= tile_budget

    def reduce_fits(tm_, tn_, tk_):
        return (2 * tm_ * tk_ * in_isz + 2 * tn_ * tk_ * in_isz
                + 2 * tm_ * tn_ * out_isz + tm_ * tn_ * 4) <= tile_budget

    # Prefer the fused single-pass kernel (tk = D): no k axis, no accumulator.
    if tk is None:
        fused = fused_fits(tm, tn, False)
        if not fused:
            tk = _pick_tile(D, 1024, lane_aligns)
            if tk == D:        # no 128-aligned divisor of D -> must fuse anyway
                fused = True
    else:
        fused = tk >= D
        tk = min(tk, D)

    # ---- fused single-pass path ---------------------------------------------
    if fused:
        # Guard the forced-fused case: shrink tm/tn (keeping divisors of N)
        # until the tiles fit the VMEM budget.
        while not fused_fits(tm, tn, False):
            if tn > 128:
                new_tn = _pick_tile(N, max(128, tn // 2), lane_aligns)
                if new_tn < tn:
                    tn = new_tn
                    continue
            if tm > row_align:
                new_tm = _pick_tile(N, max(row_align, tm // 2), (row_align,))
                if new_tm < tm:
                    tm = new_tm
                    continue
            break  # cannot shrink further; let the compiler try as-is

        resident = (N > tn and N * D * in_isz <= resident_bytes
                    and fused_fits(tm, tn, True))

        cparams = pltpu.CompilerParams(
            dimension_semantics=("parallel", "parallel"),
            vmem_limit_bytes=vmem_limit,
        )
        if resident:
            kernel = functools.partial(_fused_resident_kernel,
                                       use_sigmoid=use_sigmoid, tm=tm, tn=tn)
            in_specs = [pl.BlockSpec((N, D), lambda i, j: (0, 0))]  # fetched once
            operands = (z,)
        else:
            kernel = functools.partial(_fused_kernel, use_sigmoid=use_sigmoid)
            in_specs = [pl.BlockSpec((tm, D), lambda i, j: (i, 0)),
                        pl.BlockSpec((tn, D), lambda i, j: (j, 0))]
            operands = (z, z)

        return pl.pallas_call(
            kernel,
            out_shape=jax.ShapeDtypeStruct((N, N), out_dtype),
            grid_spec=pltpu.PrefetchScalarGridSpec(
                num_scalar_prefetch=0,
                grid=(N // tm, N // tn),
                in_specs=in_specs,
                out_specs=pl.BlockSpec((tm, tn), lambda i, j: (i, j)),
            ),
            compiler_params=cparams,
        )(*operands)

    # ---- k-reduction fallback (large D) ---------------------------------------
    assert D % tk == 0 and (tk == D or tk % 128 == 0), \
        "tk must be a multiple of 128 that divides D"
    while not reduce_fits(tm, tn, tk) and tk > 128:
        new_tk = _pick_tile(D, max(128, tk // 2), lane_aligns)
        if new_tk >= tk:
            break
        tk = new_tk

    cparams = pltpu.CompilerParams(
        dimension_semantics=("parallel", "parallel", "arbitrary"),
        vmem_limit_bytes=vmem_limit,
    )
    in_specs = [pl.BlockSpec((tm, tk), lambda i, j, k: (i, k)),
                pl.BlockSpec((tn, tk), lambda i, j, k: (j, k))]
    out_spec = pl.BlockSpec((tm, tn), lambda i, j, k: (i, j))

    if jnp.dtype(out_dtype) == jnp.float32:
        kernel = functools.partial(_reduce_f32out_kernel, use_sigmoid=use_sigmoid)
        scratch = []      # accumulate directly in the resident f32 output tile
    else:
        kernel = functools.partial(_reduce_acc_kernel, use_sigmoid=use_sigmoid)
        scratch = [pltpu.VMEM((tm, tn), jnp.float32)]

    return pl.pallas_call(
        kernel,
        out_shape=jax.ShapeDtypeStruct((N, N), out_dtype),
        grid_spec=pltpu.PrefetchScalarGridSpec(
            num_scalar_prefetch=0,
            grid=(N // tm, N // tn, D // tk),
            in_specs=in_specs,
            out_specs=out_spec,
            scratch_shapes=scratch,
        ),
        compiler_params=cparams,
    )(z, z)


def decoder_reference(z, use_sigmoid=True):
    out = z @ z.T
    return jax.nn.sigmoid(out) if use_sigmoid else out


if __name__ == "__main__":
    key = jax.random.PRNGKey(0)
    k0, k1 = jax.random.split(key)

    # Small node-embedding matrix (N nodes, D features), as in link prediction.
    N, D = 256, 128
    z = jax.random.normal(k0, (N, D), dtype=jnp.float32)
    ref = decoder_reference(z, use_sigmoid=True)

    # 1) default path: fused single-pass kernel (tk = D), with sigmoid
    out = jax.block_until_ready(decoder_forward(z, use_sigmoid=True))
    assert out.shape == (N, N)
    assert jnp.allclose(out, ref, atol=1e-4, rtol=1e-4), "mismatch (fused, sigmoid)"

    # 2) fused kernel, no sigmoid
    out2 = jax.block_until_ready(decoder_forward(z, use_sigmoid=False))
    ref2 = decoder_reference(z, use_sigmoid=False)
    assert jnp.allclose(out2, ref2, atol=1e-4, rtol=1e-4), "mismatch (fused, no sigmoid)"

    # 3) smaller tiles -> exercises the single-copy VMEM-resident z kernel
    out3 = jax.block_until_ready(decoder_forward(z, use_sigmoid=True, tm=128, tn=128))
    assert jnp.allclose(out3, ref, atol=1e-4, rtol=1e-4), "mismatch (resident z)"

    # 4) larger D with forced tk < D -> exercises the k-reduction path (f32 out)
    N2, D2 = 256, 256
    z2 = jax.random.normal(k1, (N2, D2), dtype=jnp.float32)
    out4 = jax.block_until_ready(decoder_forward(z2, use_sigmoid=True, tk=128))
    ref4 = decoder_reference(z2, use_sigmoid=True)
    assert jnp.allclose(out4, ref4, atol=1e-4, rtol=1e-4), "mismatch (k-reduction)"

    # 5) bf16 operands (native MXU path), f32 accumulation + output, loose tol
    out5 = jax.block_until_ready(
        decoder_forward(z, use_sigmoid=True, compute_dtype=jnp.bfloat16,
                        out_dtype=jnp.float32))
    assert jnp.allclose(out5, ref, atol=1e-1), "mismatch (bf16 operands)"

    # 6) bf16 output (halves the dominant N^2 store traffic), k-reduction +
    #    scratch-accumulator kernel
    out6 = jax.block_until_ready(
        decoder_forward(z2, use_sigmoid=True, tk=128, out_dtype=jnp.bfloat16))
    assert jnp.allclose(out6.astype(jnp.float32), ref4, atol=5e-3), \
        "mismatch (bf16 output, k-reduction)"

    print("KERNEL_OK")
</pallas_src>

<mosaic_0001>
module attributes {stable_mosaic.version = 11 : i64} {
  func.func @_fused_kernel(%arg0: i32, %arg1: i32, %arg2: memref<128x128xf32, #tpu.memory_space<vmem>>, %arg3: memref<256x128xf32, #tpu.memory_space<vmem>>, %arg4: memref<128x256xf32, #tpu.memory_space<vmem>>) attributes {dimension_semantics = [#tpu.dimension_semantics<parallel>, #tpu.dimension_semantics<parallel>], iteration_bounds = array<i64: 2, 1>, scalar_prefetch = 0 : i64, scratch_operands = 0 : i64, tpu.core_type = #tpu.core_type<tc>, window_params = [{transform_indices = @transform_0, window_bounds = array<i64: 128, 128>}, {transform_indices = @transform_1, window_bounds = array<i64: 256, 128>}, {transform_indices = @transform_2, window_bounds = array<i64: 128, 256>}]} {
    %c0 = arith.constant 0 : index
    %c0_0 = arith.constant 0 : index
    %0 = vector.load %arg2[%c0, %c0_0] : memref<128x128xf32, #tpu.memory_space<vmem>>, vector<128x128xf32>
    %c0_1 = arith.constant 0 : index
    %c0_2 = arith.constant 0 : index
    %1 = vector.load %arg3[%c0_1, %c0_2] : memref<256x128xf32, #tpu.memory_space<vmem>>, vector<256x128xf32>
    %cst = arith.constant dense<0.000000e+00> : vector<128x256xf32>
    %2 = tpu.matmul %0, %1, %cst {dimension_numbers = #tpu.dot_dimension_numbers<[1], [1], [0], [0], [0, 0, 1, 0], [], []>} : vector<128x128xf32>, vector<256x128xf32>, vector<128x256xf32> -> vector<128x256xf32>
    %cst_3 = arith.constant 5.000000e-01 : f32
    %3 = vector.broadcast %cst_3 : f32 to vector<128x256xf32>
    %4 = arith.mulf %3, %2 : vector<128x256xf32>
    %5 = math.tanh %4 : vector<128x256xf32>
    %cst_4 = arith.constant 5.000000e-01 : f32
    %6 = vector.broadcast %cst_4 : f32 to vector<128x256xf32>
    %7 = arith.mulf %6, %5 : vector<128x256xf32>
    %cst_5 = arith.constant 5.000000e-01 : f32
    %8 = vector.broadcast %cst_5 : f32 to vector<128x256xf32>
    %9 = arith.addf %7, %8 : vector<128x256xf32>
    %c0_6 = arith.constant 0 : index
    %c0_7 = arith.constant 0 : index
    %10 = vector.load %arg4[%c0_6, %c0_7] : memref<128x256xf32, #tpu.memory_space<vmem>>, vector<128x256xf32>
    tpu.vector_store %arg4[%c0_6, %c0_7], %9 {strides = array<i32>} : memref<128x256xf32, #tpu.memory_space<vmem>>, vector<128x256xf32>,
    return
  }
  func.func @transform_0(%arg0: i32, %arg1: i32) -> (i32, i32) {
    %c0_i32 = arith.constant 0 : i32
    %c0_i32_0 = arith.constant 0 : i32
    return %arg0, %c0_i32 : i32, i32
  }
  func.func @transform_1(%arg0: i32, %arg1: i32) -> (i32, i32) {
    %c0_i32 = arith.constant 0 : i32
    %c0_i32_0 = arith.constant 0 : i32
    return %arg1, %c0_i32 : i32, i32
  }
  func.func @transform_2(%arg0: i32, %arg1: i32) -> (i32, i32) {
    %c0_i32 = arith.constant 0 : i32
    return %arg0, %arg1 : i32, i32
  }
}

</mosaic_0001>

<bundles_post_ra>
// kernel: tpu_custom_call.1
= control target key start
LH: loop header
LB: loop body
LE: loop exit
PB: predicated region body
PF: predicated region fallthrough
CT: control target
= control target key end

     0   :  { %7 = vsyncpa [#allocation3], 0  ;;  %s1356_s0 = inlined_call_operand.hbm [shape: f32[256,128], index: 0, kind: input, shape index: {}]   ;;  %s1357_s1 = inlined_call_operand.hbm [shape: f32[256,128], index: 1, kind: input, shape index: {}]   ;;  %s1358_s2 = inlined_call_operand.hbm [shape: f32[256,256], index: 2, kind: output, shape index: {}]  }
   0x1   :  { %9 = vsyncpa [#allocation3 + $0x1], 0 }
   0x2   :  { %10 = vsyncpa [#allocation6], 0 }
   0x3   :  { %11 = vsyncpa [#allocation4], 0 }
   0x4   :  { %13 = vsyncpa [#allocation4 + $0x1], 0  ;;  %s1105_s9 = smov 0   ;;  %s1107_s10 = smov 0  }
   0x5   :  { %s1109_s11 = smov 0   ;;  %s1111_s12 = smov 0  }
   0x6   :  { %s1113_s13 = smov 0   ;;  %s1115_s14 = smov 0  }
   0x7 LB: > { %s685_s15 = sadd.s32 4294967295, %s1081_s14   ;;  %s686_s16 = sadd.s32 4294967294, %s1081_s14   ;;  %s1081_s14 = sphi %s1115_s14, %s19_s14   ;;  %s1077_s13 = sphi %s1113_s13, %s1378_s13   ;;  %s1073_s12 = sphi %s1111_s12, %s1377_s12   ;;  %s1069_s11 = sphi %s1109_s11, %s1376_s11   ;;  %s1065_s10 = sphi %s1107_s10, %s1375_s10   ;;  %s1061_s9 = sphi %s1105_s9, %s1374_s9  }
   0x8   : > { %p51_p0 = scmp.ne.s32.totalorder %s1065_s10, %s1061_s9  ;;  %p1139_p1 = scmp.eq.s32.totalorder %s685_s15, 0 }
   0x9   : > { %p1143_p2 = scmp.eq.s32.totalorder %s685_s15, 1  ;;  %p109_p3 = scmp.eq.s32.totalorder %s686_s16, 1 }
   0xa   : > { %p1149_p4 = por %p1139_p1, %p51_p0  ;;  %p687_p5 = scmp.ge.s32.totalorder %s1081_s14, 1 }
   0xb   : > { %p1154_p6 = por %p109_p3, %p51_p0  ;;  %p116_p7 = scmp.lt.s32.totalorder %s1081_s14, 3 }
   0xc   : > { %s1363_s19 = scalar_select %p1149_p4, 1, 0 }
   0xd   : > { %s1364_s20 = scalar_select %p1154_p6, 1, 0 }
   0xe   : > { %p1159_p8 = pnand %p687_p5, %p116_p7  ;;  %s1083_s22 = smov [#allocation5]  }
   0xf   : > { %s131_s23 = sshll.u32 %s1083_s22, 4  ;;  %s31_s25 = sadd.s32 1, %s1077_s13  ;;  %s132_s23 = int_to_ptr.vmem [resolvable:$true] %s131_s23 }
  0x10   : > { %p810_p9 = pneg %p1159_p8  ;;  %s954_s26 = scalar_lea.vmem %s132_s23, 4096 }
  0x11   : > { %p955_p13 = scmp.ne.s32.totalorder %s132_s23, %s954_s26  ;;  %p962_p5 = scmp.lt.s32.totalorder %s132_s23, %s132_s23 }
  0x12   : > { %p1168_p11 = pnand %p810_p9, %p1139_p1  ;;  %p963_p7 = scmp.lt.s32.totalorder %s954_s26, %s954_s26 }
  0x14   : > { %p945_p12 = pneg %p1168_p11  ;;  %p964_p6 = por %p963_p7, %p962_p5 }
  0x16   : > { %p957_p0 = pnand %p955_p13, %p945_p12 }
  0x18   : > { %p958_p3 = pneg %p957_p0 }
  0x1a   : > { %p965_p4 = pnand %p964_p6, %p958_p3 }
  0x1c   : > { %968 = shalt.err (!%p965_p4)
}
  0x1d   : > { %s1360_s27 = smov 128   ;;  %s1085_s28 = smov 8  }
  0x1e   : > { %813 = dma.hbm_to_vmem [thread:$0]  (!%p1168_p11), %s1357_s1, 4096, %s132_s23, [#allocation6], %s1360_s27, %s1360_s27, %s1085_s28  }
  0x1f   : > { %p33_p4 = scmp.ge.s32.totalorder %s31_s25, 2  ;;  %s38_s3 = sadd.s32 1, %s1069_s11 }
  0x20   : > { %p45_p6 = scmp.ne.s32.totalorder %s1069_s11, %s1065_s10  ;;  %p46_p9 = scmp.eq.s32.totalorder %s1081_s14, 0 }
  0x21   : > { %s1380_s25 = smov (%p33_p4, %s31_s25), 0  ;;  %p823_p0 = scmp.lt.s32.totalorder %s1081_s14, 2 }
  0x22   : > { %p1189_p12 = por %p46_p9, %p45_p6  ;;  %p1195_p13 = por %p1143_p2, %p45_p6 }
  0x23   : > { %s35_s6 = ssub.s32 %s1077_s13, %s1380_s25  ;;  %s145_s7 = sand.u32 1, %s1069_s11  }
  0x24   : > { %p36_p11 = scmp.eq.s32.totalorder %s35_s6, 0  ;;  %s690_s8 = sshll.u32 %s145_s7, 7 }
  0x25   : > { %s703_s16 = sshll.u32 %s1077_s13, 11  ;;  %s149_s26 = scalar_lea.vmem [#allocation2], %s690_s8 }
  0x26   : > { %s1204_s15 = scalar_select %p36_p11, %s1069_s11, %s38_s3  }
  0x27   : > { %s155_s24 = scalar_lea.hbm %s1356_s0, %s703_s16  ;;  %s156_s29 = sshll.u32 %s149_s26, 4  ;;  %s157_s29 = int_to_ptr.vmem [resolvable:$true] %s156_s29 }
  0x28   : > { %p1212_p2 = pnand %p823_p0, %p1189_p12  ;;  %s146_s30 = scalar_lea.sflag [#allocation3], %s145_s7 }
  0x29   : > { %s982_s6 = scalar_lea.vmem %s157_s29, 2048  ;;  %s1086_s3 = smov [#allocation2]  }
  0x2a   : > { %p971_p3 = pneg %p1212_p2  ;;  %p983_p5 = scmp.ne.s32.totalorder %s157_s29, %s982_s6 }
  0x2b   : > { %s987_s27 = sshll.u32 %s1086_s3, 4  ;;  %s988_s27 = int_to_ptr.vmem [resolvable:$false] %s987_s27 }
  0x2c   : > { %p985_p7 = pnand %p983_p5, %p971_p3  ;;  %s989_s16 = scalar_lea.vmem %s988_s27, 4096 }
  0x2d   : > { %p990_p6 = scmp.lt.s32.totalorder %s157_s29, %s988_s27  ;;  %p991_p9 = scmp.lt.s32.totalorder %s989_s16, %s982_s6 }
  0x2e   : > { %p986_p4 = pneg %p985_p7 }
  0x2f   : > { %p992_p11 = por %p991_p9, %p990_p6 }
  0x31   : > { %p993_p10 = pnand %p992_p11, %p986_p4 }
  0x33   : > { %996 = shalt.err (!%p993_p10)
}
  0x34   : > { %s1370_s4 = smov 128   ;;  %168 = sbr.rel (%p1159_p8) target bundleno = 383 (0x17f), region = 28 }
  0x35   : > { %817 = dma.hbm_to_vmem [thread:$0]  (!%p1212_p2), %s155_s24, 2048, %s157_s29, %s146_s30, %s1370_s4, %s1370_s4, %s1085_s28  }
  0x36   : > { %s1226_s7 = sand.u32 (!%p1159_p8), 1, %s1065_s10   ;;  %p1371_p10 = scmp.ne.s32.totalorder (!%p1159_p8), %s1363_s19, 0 }
  0x37   : > { %s694_s27 = sshll.u32 (!%p1159_p8), %s1226_s7, 7  ;;  %s171_s8 = scalar_lea.sflag (!%p1159_p8), [#allocation3], %s1226_s7 }
  0x38   : > { %s1230_s22 = scalar_lea.vmem (!%p1159_p8), [#allocation2], %s694_s27 }
  0x39   : > { %1048 = dma.done.wait (%p1371_p10), %s171_s8, 2048  }
  0x3a   : > { %1050 = vsyncadd (%p1371_p10), %s171_s8, 4294965248 }
  0x3b   : > { %1052 = dma.done.wait (%p1139_p1), [#allocation6], 4096  }
  0x3c   : > { %1054 = vsyncadd (%p1139_p1), [#allocation6], 4294963200  ;;  %v250_v0 = vld [vmem:[#allocation5 + $0xf8] sm:$0xff]  ;;  %v249_v2 = vld [vmem:[#allocation5 + $0xf0] sm:$0xff]  ;;  %s696_s17 = sshll.u32 %s1226_s7, 8  ;;  %s705_s21 = sshll.u32 %s1073_s12, 12 }
  0x3d   : > { %v234_v1 = vld [vmem:[#allocation5 + $0x78] sm:$0xff]  ;;  %706 = vmatprep.subr.mxu0 %v250_v0  ;;  %770 = vmatprep.subr.mxu1 %v250_v0  ;;  %v233_v3 = vld [vmem:[#allocation5 + $0x70] sm:$0xff]  ;;  %v248_v4 = vld [vmem:[#allocation5 + $0xe8] sm:$0xff]  ;;  %s1267_s19 = scalar_lea.vmem [#allocation7], %s696_s17  ;;  %s1303_s26 = scalar_lea.hbm %s1358_s2, %s705_s21 }
  0x3e   : > { %707 = vmatpush3.xpose.msra.mxu0 %v234_v1  ;;  %786 = vmatpush3.xpose.msra.mxu1 %v234_v1  ;;  %v232_v5 = vld [vmem:[#allocation5 + $0x68] sm:$0xff]  ;;  %v247_v6 = vld [vmem:[#allocation5 + $0xe0] sm:$0xff]  ;;  %v246_v10 = vld [vmem:[#allocation5 + $0xd8] sm:$0xff]  ;;  %s589_s28 = sshll.u32 %s1267_s19, 4  ;;  %s573_s12 = scalar_lea.sflag [#allocation4], %s1226_s7  ;;  %s1305_s28 = int_to_ptr.vmem [resolvable:$true] %s589_s28 }
  0x3f   : > { %708 = vmatprep.subr.mxu0 %v249_v2  ;;  %771 = vmatprep.subr.mxu1 %v249_v2  ;;  %v1241_v7 = vld [vmem:[%s1230_s22] sm:$0xff]  ;;  %v230_v11 = vld [vmem:[#allocation5 + $0x58] sm:$0xff]  ;;  %v245_v12 = vld [vmem:[#allocation5 + $0xd0] sm:$0xff]  ;;  %s997_s29 = scalar_lea.vmem %s1305_s28, 4096  ;;  %s1087_s18 = smov [#allocation7]  }
  0x40   : > { %v231_v8 = vld [vmem:[#allocation5 + $0x60] sm:$0xff]  ;;  %738 = vmatprep.mubr.f32.mxu0 %v1241_v7  ;;  %v229_v13 = vld [vmem:[#allocation5 + $0x50] sm:$0xff]  ;;  %v244_v14 = vld [vmem:[#allocation5 + $0xc8] sm:$0xff]  ;;  %p998_p1 = scmp.ne.s32.totalorder %s1305_s28, %s997_s29  ;;  %s1001_s30 = sshll.u32 %s1087_s18, 4  ;;  %s1002_s30 = int_to_ptr.vmem [resolvable:$false] %s1001_s30 }
  0x41   : > { %v1244_v9 = vld [vmem:[%s1230_s22 + $0x40] sm:$0xff]  ;;  %v228_v15 = vld [vmem:[#allocation5 + $0x48] sm:$0xff]  ;;  %v242_v18 = vld [vmem:[#allocation5 + $0xb8] sm:$0xff]  ;;  %s1003_s6 = scalar_lea.vmem %s1002_s30, 8192  ;;  %p1004_p0 = scmp.lt.s32.totalorder %s1305_s28, %s1002_s30 }
  0x42   : > { %709 = vmatpush3.xpose.msra.mxu0 %v233_v3  ;;  %787 = vmatpush3.xpose.msra.mxu1 %v233_v3  ;;  %v243_v16 = vld [vmem:[#allocation5 + $0xc0] sm:$0xff]  ;;  %v226_v19 = vld [vmem:[#allocation5 + $0x38] sm:$0xff]  ;;  %v241_v20 = vld [vmem:[#allocation5 + $0xb0] sm:$0xff]  ;;  %p999_p8 = pnand %p998_p1, %p1195_p13  ;;  %p1005_p2 = scmp.lt.s32.totalorder %s1003_s6, %s997_s29 }
  0x43   : > { %710 = vmatprep.subr.mxu0 %v248_v4  ;;  %772 = vmatprep.subr.mxu1 %v248_v4  ;;  %v227_v17 = vld [vmem:[#allocation5 + $0x40] sm:$0xff]  ;;  %v225_v21 = vld [vmem:[#allocation5 + $0x30] sm:$0xff]  ;;  %v240_v22 = vld [vmem:[#allocation5 + $0xa8] sm:$0xff] }
  0x44   : > { %754 = vmatprep.mubr.f32.mxu1 %v1244_v9  ;;  %v224_v23 = vld [vmem:[#allocation5 + $0x28] sm:$0xff]  ;;  %v239_v24 = vld [vmem:[#allocation5 + $0xa0] sm:$0xff]  ;;  %v238_v26 = vld [vmem:[#allocation5 + $0x98] sm:$0xff]  ;;  %p1000_p12 = pneg %p999_p8  ;;  %p1006_p3 = por %p1005_p2, %p1004_p0 }
  0x45   : > { %v223_v25 = vld [vmem:[#allocation5 + $0x20] sm:$0xff]  ;;  %v222_v27 = vld [vmem:[#allocation5 + $0x18] sm:$0xff]  ;;  %v237_v28 = vld [vmem:[#allocation5 + $0x90] sm:$0xff] }
  0x46   : > { %711 = vmatpush3.xpose.msra.mxu0 %v232_v5  ;;  %788 = vmatpush3.xpose.msra.mxu1 %v232_v5  ;;  %v221_v29 = vld [vmem:[#allocation5 + $0x10] sm:$0xff]  ;;  %v236_v30 = vld [vmem:[#allocation5 + $0x88] sm:$0xff]  ;;  %v235_v32 = vld [vmem:[#allocation5 + $0x80] sm:$0xff]  ;;  %p1007_p5 = pnand %p1006_p3, %p1000_p12 }
  0x47   : > { %712 = vmatprep.subr.mxu0 %v247_v6  ;;  %773 = vmatprep.subr.mxu1 %v247_v6  ;;  %v220_v31 = vld [vmem:[#allocation5 + $0x8] sm:$0xff]  ;;  %v219_v33 = vld [vmem:[#allocation5] sm:$0xff]  ;;  %v205_v36 = vld [vmem:[%s1230_s22 + $0x10] sm:$0xff] }
  0x48   : > { %v204_v34 = vld [vmem:[%s1230_s22 + $0x8] sm:$0xff]  ;;  %v213_v37 = vld [vmem:[%s1230_s22 + $0x50] sm:$0xff]  ;;  %v206_v38 = vld [vmem:[%s1230_s22 + $0x18] sm:$0xff] }
  0x49   : > { %v212_v35 = vld [vmem:[%s1230_s22 + $0x48] sm:$0xff]  ;;  %v214_v39 = vld [vmem:[%s1230_s22 + $0x58] sm:$0xff]  ;;  %v207_v40 = vld [vmem:[%s1230_s22 + $0x20] sm:$0xff] }
  0x4a   : > { %713 = vmatpush3.xpose.msra.mxu0 %v231_v8  ;;  %789 = vmatpush3.xpose.msra.mxu1 %v231_v8  ;;  %v215_v41 = vld [vmem:[%s1230_s22 + $0x60] sm:$0xff]  ;;  %v208_v42 = vld [vmem:[%s1230_s22 + $0x28] sm:$0xff]  ;;  %v209_v44 = vld [vmem:[%s1230_s22 + $0x30] sm:$0xff] }
  0x4b   : > { %714 = vmatprep.subr.mxu0 %v246_v10  ;;  %774 = vmatprep.subr.mxu1 %v246_v10  ;;  %v216_v43 = vld [vmem:[%s1230_s22 + $0x68] sm:$0xff]  ;;  %v217_v45 = vld [vmem:[%s1230_s22 + $0x70] sm:$0xff]  ;;  %v210_v46 = vld [vmem:[%s1230_s22 + $0x38] sm:$0xff] }
  0x4c   : > { %v218_v47 = vld [vmem:[%s1230_s22 + $0x78] sm:$0xff] }
  0x4e   : > { %715 = vmatpush3.xpose.msra.mxu0 %v230_v11  ;;  %790 = vmatpush3.xpose.msra.mxu1 %v230_v11 }
  0x4f   : > { %716 = vmatprep.subr.mxu0 %v245_v12  ;;  %775 = vmatprep.subr.mxu1 %v245_v12 }
  0x52   : > { %717 = vmatpush3.xpose.msra.mxu0 %v229_v13  ;;  %791 = vmatpush3.xpose.msra.mxu1 %v229_v13 }
  0x53   : > { %718 = vmatprep.subr.mxu0 %v244_v14  ;;  %776 = vmatprep.subr.mxu1 %v244_v14 }
  0x56   : > { %719 = vmatpush3.xpose.msra.mxu0 %v228_v15  ;;  %792 = vmatpush3.xpose.msra.mxu1 %v228_v15 }
  0x57   : > { %720 = vmatprep.subr.mxu0 %v243_v16  ;;  %777 = vmatprep.subr.mxu1 %v243_v16 }
  0x5a   : > { %721 = vmatpush3.xpose.msra.mxu0 %v227_v17  ;;  %793 = vmatpush3.xpose.msra.mxu1 %v227_v17 }
  0x5b   : > { %722 = vmatprep.subr.mxu0 %v242_v18  ;;  %778 = vmatprep.subr.mxu1 %v242_v18 }
  0x5e   : > { %723 = vmatpush3.xpose.msra.mxu0 %v226_v19  ;;  %794 = vmatpush3.xpose.msra.mxu1 %v226_v19 }
  0x5f   : > { %724 = vmatprep.subr.mxu0 %v241_v20  ;;  %779 = vmatprep.subr.mxu1 %v241_v20 }
  0x62   : > { %725 = vmatpush3.xpose.msra.mxu0 %v225_v21  ;;  %795 = vmatpush3.xpose.msra.mxu1 %v225_v21 }
  0x63   : > { %726 = vmatprep.subr.mxu0 %v240_v22  ;;  %780 = vmatprep.subr.mxu1 %v240_v22 }
  0x66   : > { %727 = vmatpush3.xpose.msra.mxu0 %v224_v23  ;;  %796 = vmatpush3.xpose.msra.mxu1 %v224_v23 }
  0x67   : > { %728 = vmatprep.subr.mxu0 %v239_v24  ;;  %781 = vmatprep.subr.mxu1 %v239_v24 }
  0x6a   : > { %729 = vmatpush3.xpose.msra.mxu0 %v223_v25  ;;  %797 = vmatpush3.xpose.msra.mxu1 %v223_v25 }
  0x6b   : > { %730 = vmatprep.subr.mxu0 %v238_v26  ;;  %782 = vmatprep.subr.mxu1 %v238_v26 }
  0x6e   : > { %731 = vmatpush3.xpose.msra.mxu0 %v222_v27  ;;  %798 = vmatpush3.xpose.msra.mxu1 %v222_v27 }
  0x6f   : > { %732 = vmatprep.subr.mxu0 %v237_v28  ;;  %783 = vmatprep.subr.mxu1 %v237_v28 }
  0x72   : > { %733 = vmatpush3.xpose.msra.mxu0 %v221_v29  ;;  %799 = vmatpush3.xpose.msra.mxu1 %v221_v29 }
  0x73   : > { %734 = vmatprep.subr.mxu0 %v236_v30  ;;  %784 = vmatprep.subr.mxu1 %v236_v30 }
  0x76   : > { %735 = vmatpush3.xpose.msra.mxu0 %v220_v31  ;;  %800 = vmatpush3.xpose.msra.mxu1 %v220_v31 }
  0x77   : > { %736 = vmatprep.subr.mxu0 %v235_v32  ;;  %785 = vmatprep.subr.mxu1 %v235_v32 }
  0x7a   : > { %737 = vmatpush3.xpose.msra.mxu0 %v219_v33  ;;  %801 = vmatpush3.xpose.msra.mxu1 %v219_v33 }
  0x7d   : > { %739 = vmatmul.mubr.f32.vlgmr.msra.gmra.mxu0 %v1241_v7  ;;  %755 = vmatmul.mubr.f32.vlgmr.msra.gmra.mxu1 %v1244_v9 }
  0x7e   : > { %740 = vmatprep.mubr.f32.mxu0 %v204_v34  ;;  %756 = vmatprep.mubr.f32.mxu1 %v212_v35 }
  0x81   : > { %741 = vmatmul.mubr.f32.gmra.mxu0 %v204_v34  ;;  %757 = vmatmul.mubr.f32.gmra.mxu1 %v212_v35 }
  0x82   : > { %742 = vmatprep.mubr.f32.mxu0 %v205_v36  ;;  %758 = vmatprep.mubr.f32.mxu1 %v213_v37 }
  0x85   : > { %743 = vmatmul.mubr.f32.gmra.mxu0 %v205_v36  ;;  %759 = vmatmul.mubr.f32.gmra.mxu1 %v213_v37 }
  0x86   : > { %744 = vmatprep.mubr.f32.mxu0 %v206_v38  ;;  %760 = vmatprep.mubr.f32.mxu1 %v214_v39 }
  0x89   : > { %745 = vmatmul.mubr.f32.gmra.mxu0 %v206_v38  ;;  %761 = vmatmul.mubr.f32.gmra.mxu1 %v214_v39 }
  0x8a   : > { %746 = vmatprep.mubr.f32.mxu0 %v207_v40  ;;  %762 = vmatprep.mubr.f32.mxu1 %v215_v41 }
  0x8d   : > { %747 = vmatmul.mubr.f32.gmra.mxu0 %v207_v40  ;;  %763 = vmatmul.mubr.f32.gmra.mxu1 %v215_v41 }
  0x8e   : > { %748 = vmatprep.mubr.f32.mxu0 %v208_v42  ;;  %764 = vmatprep.mubr.f32.mxu1 %v216_v43 }
  0x91   : > { %749 = vmatmul.mubr.f32.gmra.mxu0 %v208_v42  ;;  %765 = vmatmul.mubr.f32.gmra.mxu1 %v216_v43 }
  0x92   : > { %750 = vmatprep.mubr.f32.mxu0 %v209_v44  ;;  %766 = vmatprep.mubr.f32.mxu1 %v217_v45 }
  0x95   : > { %751 = vmatmul.mubr.f32.gmra.mxu0 %v209_v44  ;;  %767 = vmatmul.mubr.f32.gmra.mxu1 %v217_v45 }
  0x96   : > { %752 = vmatprep.mubr.f32.mxu0 %v210_v46  ;;  %768 = vmatprep.mubr.f32.mxu1 %v218_v47 }
  0x99   : > { %753 = vmatmul.mubr.f32.gmra.mxu0 %v210_v46  ;;  %769 = vmatmul.mubr.f32.gmra.mxu1 %v218_v47 }
 0x13d   : > { %v317_v48 = vpop.f32.mrf.mxu0  ;;  %v365_v49 = vpop.f32.mrf.mxu1 }
 0x13e   : > { %v412_v50 = vmul.f32 0.5, %v317_v48  ;;  %v428_v51 = vmul.f32 0.5, %v365_v49 }
 0x13f   : > { %v319_v52 = vpop.f32.mrf.mxu0  ;;  %v367_v53 = vpop.f32.mrf.mxu1 }
 0x140   : > { %879 = vtanh.f32 %v412_v50  ;;  %v413_v54 = vmul.f32 0.5, %v319_v52  ;;  %v429_v55 = vmul.f32 0.5, %v367_v53 }
 0x141   : > { %881 = vtanh.f32 %v428_v51  ;;  %v323_v56 = vpop.f32.mrf.mxu0  ;;  %v371_v57 = vpop.f32.mrf.mxu1 }
 0x142   : > { %883 = vtanh.f32 %v413_v54  ;;  %v414_v58 = vmul.f32 0.5, %v323_v56  ;;  %v430_v59 = vmul.f32 0.5, %v371_v57 }
 0x143   : > { %885 = vtanh.f32 %v429_v55  ;;  %v325_v60 = vpop.f32.mrf.mxu0  ;;  %v373_v61 = vpop.f32.mrf.mxu1 }
 0x144   : > { %887 = vtanh.f32 %v414_v58  ;;  %v415_v62 = vmul.f32 0.5, %v325_v60  ;;  %v431_v63 = vmul.f32 0.5, %v373_v61 }
 0x145   : > { %889 = vtanh.f32 %v430_v59  ;;  %v329_v0 = vpop.f32.mrf.mxu0  ;;  %v377_v1 = vpop.f32.mrf.mxu1 }
 0x146   : > { %891 = vtanh.f32 %v415_v62  ;;  %v416_v2 = vmul.f32 0.5, %v329_v0  ;;  %v432_v3 = vmul.f32 0.5, %v377_v1 }
 0x147   : > { %893 = vtanh.f32 %v431_v63  ;;  %v331_v4 = vpop.f32.mrf.mxu0  ;;  %v379_v5 = vpop.f32.mrf.mxu1 }
 0x148   : > { %895 = vtanh.f32 %v416_v2  ;;  %v417_v6 = vmul.f32 0.5, %v331_v4  ;;  %v433_v7 = vmul.f32 0.5, %v379_v5 }
 0x149   : > { %897 = vtanh.f32 %v432_v3  ;;  %v335_v8 = vpop.f32.mrf.mxu0  ;;  %v383_v9 = vpop.f32.mrf.mxu1 }
 0x14a   : > { %899 = vtanh.f32 %v417_v6  ;;  %v418_v10 = vmul.f32 0.5, %v335_v8  ;;  %v434_v11 = vmul.f32 0.5, %v383_v9 }
 0x14b   : > { %901 = vtanh.f32 %v433_v7  ;;  %v337_v12 = vpop.f32.mrf.mxu0  ;;  %v385_v13 = vpop.f32.mrf.mxu1 }
 0x14c   : > { %903 = vtanh.f32 %v418_v10  ;;  %v419_v14 = vmul.f32 0.5, %v337_v12  ;;  %v435_v15 = vmul.f32 0.5, %v385_v13 }
 0x14d   : > { %v880_v16 = vpop.eup %879  ;;  %905 = vtanh.f32 %v434_v11  ;;  %v341_v17 = vpop.f32.mrf.mxu0 }
 0x14e   : > { %v389_v18 = vpop.f32.mrf.mxu1  ;;  %v882_v19 = vpop.eup %881  ;;  %v476_v20 = vmul.f32 0.5, %v880_v16  ;;  %907 = vtanh.f32 %v419_v14  ;;  %v420_v21 = vmul.f32 0.5, %v341_v17 }
 0x14f   : > { %v436_v22 = vmul.f32 0.5, %v389_v18  ;;  %v884_v23 = vpop.eup %883  ;;  %v492_v24 = vmul.f32 0.5, %v882_v19  ;;  %909 = vtanh.f32 %v435_v15  ;;  %v343_v25 = vpop.f32.mrf.mxu0 }
 0x150   : > { %v391_v26 = vpop.f32.mrf.mxu1  ;;  %v886_v27 = vpop.eup %885  ;;  %v508_v28 = vadd.f32 0.5, %v476_v20  ;;  %v477_v29 = vmul.f32 0.5, %v884_v23  ;;  %911 = vtanh.f32 %v420_v21  ;;  %v421_v30 = vmul.f32 0.5, %v343_v25 }
 0x151   : > { %v888_v31 = vpop.eup %887  ;;  %v524_v32 = vadd.f32 0.5, %v492_v24  ;;  %v493_v33 = vmul.f32 0.5, %v886_v27  ;;  %913 = vtanh.f32 %v436_v22  ;;  %v437_v34 = vmul.f32 0.5, %v391_v26  ;;  %v347_v35 = vpop.f32.mrf.mxu0 }
 0x152   : > { %v395_v36 = vpop.f32.mrf.mxu1  ;;  %v890_v37 = vpop.eup %889  ;;  %540 = vst [vmem:[%s1267_s19] sm:$0xff] %v508_v28  ;;  %v509_v38 = vadd.f32 0.5, %v477_v29  ;;  %v478_v39 = vmul.f32 0.5, %v888_v31  ;;  %915 = vtanh.f32 %v421_v30  ;;  %v422_v40 = vmul.f32 0.5, %v347_v35 }
 0x153   : > { %v892_v41 = vpop.eup %891  ;;  %556 = vst [vmem:[%s1267_s19 + $0x80] sm:$0xff] %v524_v32  ;;  %v525_v42 = vadd.f32 0.5, %v493_v33  ;;  %v494_v43 = vmul.f32 0.5, %v890_v37  ;;  %917 = vtanh.f32 %v437_v34  ;;  %v438_v44 = vmul.f32 0.5, %v395_v36  ;;  %v349_v45 = vpop.f32.mrf.mxu0 }
 0x154   : > { %v397_v46 = vpop.f32.mrf.mxu1  ;;  %v894_v47 = vpop.eup %893  ;;  %541 = vst [vmem:[%s1267_s19 + $0x8] sm:$0xff] %v509_v38  ;;  %v510_v48 = vadd.f32 0.5, %v478_v39  ;;  %v479_v49 = vmul.f32 0.5, %v892_v41  ;;  %919 = vtanh.f32 %v422_v40  ;;  %v423_v50 = vmul.f32 0.5, %v349_v45 }
 0x155   : > { %v896_v51 = vpop.eup %895  ;;  %557 = vst [vmem:[%s1267_s19 + $0x88] sm:$0xff] %v525_v42  ;;  %v526_v52 = vadd.f32 0.5, %v494_v43  ;;  %v495_v53 = vmul.f32 0.5, %v894_v47  ;;  %921 = vtanh.f32 %v438_v44  ;;  %v439_v54 = vmul.f32 0.5, %v397_v46  ;;  %v353_v55 = vpop.f32.mrf.mxu0 }
 0x156   : > { %v401_v56 = vpop.f32.mrf.mxu1  ;;  %v898_v57 = vpop.eup %897  ;;  %542 = vst [vmem:[%s1267_s19 + $0x10] sm:$0xff] %v510_v48  ;;  %v511_v58 = vadd.f32 0.5, %v479_v49  ;;  %v480_v59 = vmul.f32 0.5, %v896_v51  ;;  %923 = vtanh.f32 %v423_v50  ;;  %v424_v60 = vmul.f32 0.5, %v353_v55 }
 0x157   : > { %v900_v61 = vpop.eup %899  ;;  %558 = vst [vmem:[%s1267_s19 + $0x90] sm:$0xff] %v526_v52  ;;  %v527_v62 = vadd.f32 0.5, %v495_v53  ;;  %v496_v63 = vmul.f32 0.5, %v898_v57  ;;  %925 = vtanh.f32 %v439_v54  ;;  %v440_v0 = vmul.f32 0.5, %v401_v56  ;;  %v355_v1 = vpop.f32.mrf.mxu0 }
 0x158   : > { %v403_v2 = vpop.f32.mrf.mxu1  ;;  %v902_v3 = vpop.eup %901  ;;  %543 = vst [vmem:[%s1267_s19 + $0x18] sm:$0xff] %v511_v58  ;;  %v512_v4 = vadd.f32 0.5, %v480_v59  ;;  %v481_v5 = vmul.f32 0.5, %v900_v61  ;;  %927 = vtanh.f32 %v424_v60  ;;  %v425_v6 = vmul.f32 0.5, %v355_v1 }
 0x159   : > { %v904_v7 = vpop.eup %903  ;;  %559 = vst [vmem:[%s1267_s19 + $0x98] sm:$0xff] %v527_v62  ;;  %v528_v8 = vadd.f32 0.5, %v496_v63  ;;  %v497_v9 = vmul.f32 0.5, %v902_v3  ;;  %929 = vtanh.f32 %v440_v0  ;;  %v441_v10 = vmul.f32 0.5, %v403_v2  ;;  %v359_v11 = vpop.f32.mrf.mxu0 }
 0x15a   : > { %v407_v12 = vpop.f32.mrf.mxu1  ;;  %v906_v13 = vpop.eup %905  ;;  %544 = vst [vmem:[%s1267_s19 + $0x20] sm:$0xff] %v512_v4  ;;  %v513_v14 = vadd.f32 0.5, %v481_v5  ;;  %v482_v15 = vmul.f32 0.5, %v904_v7  ;;  %931 = vtanh.f32 %v425_v6  ;;  %v426_v16 = vmul.f32 0.5, %v359_v11 }
 0x15b   : > { %v908_v17 = vpop.eup %907  ;;  %560 = vst [vmem:[%s1267_s19 + $0xa0] sm:$0xff] %v528_v8  ;;  %v529_v18 = vadd.f32 0.5, %v497_v9  ;;  %v498_v19 = vmul.f32 0.5, %v906_v13  ;;  %933 = vtanh.f32 %v441_v10  ;;  %v442_v20 = vmul.f32 0.5, %v407_v12  ;;  %v361_v21 = vpop.f32.mrf.mxu0 }
 0x15c   : > { %v409_v22 = vpop.f32.mrf.mxu1  ;;  %v910_v23 = vpop.eup %909  ;;  %545 = vst [vmem:[%s1267_s19 + $0x28] sm:$0xff] %v513_v14  ;;  %v514_v24 = vadd.f32 0.5, %v482_v15  ;;  %v483_v25 = vmul.f32 0.5, %v908_v17  ;;  %935 = vtanh.f32 %v426_v16  ;;  %v427_v26 = vmul.f32 0.5, %v361_v21 }
 0x15d   : > { %v912_v27 = vpop.eup %911  ;;  %561 = vst [vmem:[%s1267_s19 + $0xa8] sm:$0xff] %v529_v18  ;;  %v530_v28 = vadd.f32 0.5, %v498_v19  ;;  %v499_v29 = vmul.f32 0.5, %v910_v23  ;;  %937 = vtanh.f32 %v442_v20  ;;  %v443_v30 = vmul.f32 0.5, %v409_v22 }
 0x15e   : > { %v914_v31 = vpop.eup %913  ;;  %546 = vst [vmem:[%s1267_s19 + $0x30] sm:$0xff] %v514_v24  ;;  %v515_v32 = vadd.f32 0.5, %v483_v25  ;;  %v484_v33 = vmul.f32 0.5, %v912_v27  ;;  %939 = vtanh.f32 %v427_v26 }
 0x15f   : > { %v916_v34 = vpop.eup %915  ;;  %562 = vst [vmem:[%s1267_s19 + $0xb0] sm:$0xff] %v530_v28  ;;  %v531_v35 = vadd.f32 0.5, %v499_v29  ;;  %v500_v36 = vmul.f32 0.5, %v914_v31  ;;  %941 = vtanh.f32 %v443_v30 }
 0x160   : > { %v918_v37 = vpop.eup %917  ;;  %547 = vst [vmem:[%s1267_s19 + $0x38] sm:$0xff] %v515_v32  ;;  %v516_v38 = vadd.f32 0.5, %v484_v33  ;;  %v485_v39 = vmul.f32 0.5, %v916_v34 }
 0x161   : > { %v920_v40 = vpop.eup %919  ;;  %563 = vst [vmem:[%s1267_s19 + $0xb8] sm:$0xff] %v531_v35  ;;  %v532_v41 = vadd.f32 0.5, %v500_v36  ;;  %v501_v42 = vmul.f32 0.5, %v918_v37 }
 0x162   : > { %v922_v43 = vpop.eup %921  ;;  %548 = vst [vmem:[%s1267_s19 + $0x40] sm:$0xff] %v516_v38  ;;  %v517_v44 = vadd.f32 0.5, %v485_v39  ;;  %v486_v45 = vmul.f32 0.5, %v920_v40 }
 0x163   : > { %v924_v46 = vpop.eup %923  ;;  %564 = vst [vmem:[%s1267_s19 + $0xc0] sm:$0xff] %v532_v41  ;;  %v533_v47 = vadd.f32 0.5, %v501_v42  ;;  %v502_v48 = vmul.f32 0.5, %v922_v43 }
 0x164   : > { %v926_v49 = vpop.eup %925  ;;  %549 = vst [vmem:[%s1267_s19 + $0x48] sm:$0xff] %v517_v44  ;;  %v518_v50 = vadd.f32 0.5, %v486_v45  ;;  %v487_v51 = vmul.f32 0.5, %v924_v46 }
 0x165   : > { %v928_v52 = vpop.eup %927  ;;  %565 = vst [vmem:[%s1267_s19 + $0xc8] sm:$0xff] %v533_v47  ;;  %v534_v53 = vadd.f32 0.5, %v502_v48  ;;  %v503_v54 = vmul.f32 0.5, %v926_v49 }
 0x166   : > { %v930_v55 = vpop.eup %929  ;;  %550 = vst [vmem:[%s1267_s19 + $0x50] sm:$0xff] %v518_v50  ;;  %v519_v56 = vadd.f32 0.5, %v487_v51  ;;  %v488_v57 = vmul.f32 0.5, %v928_v52 }
 0x167   : > { %v932_v58 = vpop.eup %931  ;;  %566 = vst [vmem:[%s1267_s19 + $0xd0] sm:$0xff] %v534_v53  ;;  %v535_v59 = vadd.f32 0.5, %v503_v54  ;;  %v504_v60 = vmul.f32 0.5, %v930_v55 }
 0x168   : > { %v934_v61 = vpop.eup %933  ;;  %551 = vst [vmem:[%s1267_s19 + $0x58] sm:$0xff] %v519_v56  ;;  %v520_v62 = vadd.f32 0.5, %v488_v57  ;;  %v489_v63 = vmul.f32 0.5, %v932_v58 }
 0x169   : > { %v936_v0 = vpop.eup %935  ;;  %567 = vst [vmem:[%s1267_s19 + $0xd8] sm:$0xff] %v535_v59  ;;  %v536_v1 = vadd.f32 0.5, %v504_v60  ;;  %v505_v2 = vmul.f32 0.5, %v934_v61 }
 0x16a   : > { %v938_v3 = vpop.eup %937  ;;  %552 = vst [vmem:[%s1267_s19 + $0x60] sm:$0xff] %v520_v62  ;;  %v521_v4 = vadd.f32 0.5, %v489_v63  ;;  %v490_v5 = vmul.f32 0.5, %v936_v0 }
 0x16b   : > { %v940_v6 = vpop.eup %939  ;;  %568 = vst [vmem:[%s1267_s19 + $0xe0] sm:$0xff] %v536_v1  ;;  %v537_v7 = vadd.f32 0.5, %v505_v2  ;;  %v506_v8 = vmul.f32 0.5, %v938_v3 }
 0x16c   : > { %v942_v9 = vpop.eup %941  ;;  %553 = vst [vmem:[%s1267_s19 + $0x68] sm:$0xff] %v521_v4  ;;  %v522_v10 = vadd.f32 0.5, %v490_v5  ;;  %v491_v11 = vmul.f32 0.5, %v940_v6 }
 0x16d   : > { %569 = vst [vmem:[%s1267_s19 + $0xe8] sm:$0xff] %v537_v7  ;;  %v538_v12 = vadd.f32 0.5, %v506_v8  ;;  %v507_v13 = vmul.f32 0.5, %v942_v9 }
 0x16e   : > { %554 = vst [vmem:[%s1267_s19 + $0x70] sm:$0xff] %v522_v10  ;;  %v523_v14 = vadd.f32 0.5, %v491_v11 }
 0x16f   : > { %570 = vst [vmem:[%s1267_s19 + $0xf0] sm:$0xff] %v538_v12  ;;  %v539_v15 = vadd.f32 0.5, %v507_v13 }
 0x170   : > { %555 = vst [vmem:[%s1267_s19 + $0x78] sm:$0xff] %v523_v14 }
 0x171   : > { %571 = vst [vmem:[%s1267_s19 + $0xf8] sm:$0xff] %v539_v15 }
 0x172   : > { %1010 = shalt.err (!%p1007_p5)
}
 0x173   : > { %s1011_s3 = scalar_lea.hbm %s1303_s26, 4096  ;;  %s1015_s27 = scalar_lea.hbm %s1358_s2, 8192 }
 0x174   : > { %p1012_p7 = scmp.ne.s32.totalorder %s1303_s26, %s1011_s3  ;;  %p1016_p9 = scmp.lt.s32.totalorder %s1303_s26, %s1358_s2 }
 0x175   : > { %p1017_p11 = scmp.lt.s32.totalorder %s1015_s27, %s1011_s3 }
 0x176   : > { %p1013_p4 = pnand %p1012_p7, %p1195_p13 }
 0x177   : > { %p1018_p10 = por %p1017_p11, %p1016_p9 }
 0x178   : > { %p1014_p6 = pneg %p1013_p4 }
 0x17a   : > { %p1019_p1 = pnand %p1018_p10, %p1014_p6 }
 0x17c   : > { %1022 = shalt.err (!%p1019_p1)
}
 0x17d   : > { %s1088_s17 = smov 256   ;;  %s1089_s19 = smov 16  }
 0x17e   : > { %808 = dma.vmem_to_hbm [thread:$0]  (%p1195_p13), %s1305_s28, 4096, %s1303_s26, %s573_s12, %s1088_s17, %s1088_s17, %s1089_s19  }
 0x17f PF: > { %s604_s21 = sand.u32 1, %s1061_s9   ;;  %p1372_p8 = scmp.ne.s32.totalorder %s1364_s20, 0 }
 0x180   : > { %p1373_p12 = scmp.ge.s32.totalorder %s1081_s14, 2  ;;  %s605_s23 = scalar_lea.sflag [#allocation4], %s604_s21 }
 0x182   : > { %p819_p0 = pnand %p1373_p12, %p1372_p8 }
 0x184   : > { %p820_p2 = pneg %p819_p0 }
 0x186   : > { %1056 = dma.done.wait (%p820_p2), %s605_s23, 4096  }
 0x187   : > { %1058 = vsyncadd (%p820_p2), %s605_s23, 4294963200  ;;  %s19_s14 = sadd.s32 1, %s1081_s14   ;;  %s1374_s9 = smov %s1065_s10 }
 0x188   : > { %p16_p3 = scmp.ge.s32.totalorder %s19_s14, 4   ;;  %s1375_s10 = smov %s1069_s11 }
 0x189   : > { %s1376_s11 = smov %s1204_s15  ;;  %s1377_s12 = smov %s1077_s13 }
 0x18a   : > { %s1378_s13 = smov %s1380_s25  ;;  %18 = sbr.rel (!%p16_p3) target bundleno = 7 (0x7), region = 78 }
 0x18f   :  { %610 = vsyncpa [#allocation3], 1 }
 0x190   :  { %612 = vsyncpa [#allocation3 + $0x1], 1 }
 0x191   :  { %613 = vsyncpa [#allocation6], 1 }
 0x192   :  { %614 = vsyncpa [#allocation4], 1 }
 0x193   :  { %616 = vsyncpa [#allocation4 + $0x1], 1 }

</bundles_post_ra>
